<compile_context>
chip_gen: v6e
topology: v6e:2x2x1
jax: 0.10.0
libtpu: 0.0.40
codegen_flags: <defaults>
</compile_context>

<pallas_src>
import functools

import jax
import jax.numpy as jnp
from jax.experimental import pallas as pl
from jax.experimental.pallas import tpu as pltpu

LANE = 128        # feature dims / N padded to a multiple of the 128-wide lanes
ROW_TILE = 512    # node-row tile upper bound (shrunk to fit / split across TCs)
COL_TILE = 512    # neighbor (reduction) tile upper bound


def _round_up(x, m):
    return (x + m - 1) // m * m


def _pick_tile(n_pad, max_tile):
    """Largest tile <= max_tile that divides n_pad (n_pad is a multiple of 128)."""
    t = min(max_tile, n_pad)
    while n_pad % t != 0:
        t -= LANE
    return t


def _pad2(a, rows, cols):
    return jnp.pad(a, ((0, rows - a.shape[0]), (0, cols - a.shape[1])))


# ---------------------------------------------------------------------------
# Kernels
# ---------------------------------------------------------------------------

def _sage_agg_project_kernel(a_ref, scale_ref, xn_ref, xr_ref, wl_ref, wr_ref,
                             b_ref, o_ref, acc_ref, *, apply_relu):
    """acc += A_count @ X (d_in wide); epilogue: (scale*acc)@Wl + Xr@Wr + b."""
    k = pl.program_id(1)

    @pl.when(k == 0)
    def _init():
        acc_ref[...] = jnp.zeros_like(acc_ref)

    # int8 edge counts -> bf16 on the VPU, then a full-rate bf16 MXU matmul.
    a = a_ref[...].astype(jnp.bfloat16)
    acc_ref[...] += jnp.dot(a, xn_ref[...], preferred_element_type=jnp.float32)

    @pl.when(k == pl.num_programs(1) - 1)
    def _finalize():
        # Exact mean: per-row 1/deg applied in f32 to the f32 accumulator.
        agg = (acc_ref[...] * scale_ref[...]).astype(jnp.bfloat16)
        h = jnp.dot(agg, wl_ref[...], preferred_element_type=jnp.float32)
        h = h + jnp.dot(xr_ref[...], wr_ref[...],
                        preferred_element_type=jnp.float32)
        h = h + b_ref[...]            # bias added only once, in the epilogue
        if apply_relu:
            h = jnp.maximum(h, 0.0)
        o_ref[...] = h.astype(o_ref.dtype)


def _sage_agg_preprojected_kernel(a_ref, scale_ref, xwn_ref, xr_ref, wr_ref,
                                  b_ref, o_ref, acc_ref, *, apply_relu):
    """Neighbor stream is already X @ Wl (hoisted); acc += A_count @ XW."""
    k = pl.program_id(1)

    @pl.when(k == 0)
    def _init():
        acc_ref[...] = jnp.zeros_like(acc_ref)

    a = a_ref[...].astype(jnp.bfloat16)
    acc_ref[...] += jnp.dot(a, xwn_ref[...], preferred_element_type=jnp.float32)

    @pl.when(k == pl.num_programs(1) - 1)
    def _finalize():
        h = acc_ref[...] * scale_ref[...]
        h = h + jnp.dot(xr_ref[...], wr_ref[...],
                        preferred_element_type=jnp.float32)
        h = h + b_ref[...]
        if apply_relu:
            h = jnp.maximum(h, 0.0)
        o_ref[...] = h.astype(o_ref.dtype)


# ---------------------------------------------------------------------------
# Layer wrapper
# ---------------------------------------------------------------------------

def sage_conv(a_count, deg_inv, x, w_l, w_r, b, *, apply_relu, out_dtype):
    """One SAGEConv layer as a tiled pallas_call.

    a_count: (Np, Np)   int8  unnormalized in-edge counts (zero-padded)
    deg_inv: (Np, 1)    f32   exact 1/deg_in (0 for isolated / padded rows)
    x:       (Np, Din)  bf16  node features (zero-padded)
    w_l/r:   (Din, Dout) bf16, b: (1, Dout) f32   -- Din/Dout already 128-padded
    """
    n_pad = a_count.shape[0]
    d_in, d_out = w_l.shape

    tm = _pick_tile(n_pad, ROW_TILE)
    # v7x: make sure the "parallel" row axis has >=2 tiles so both TensorCores
    # get work (no effect on single-TC v5e/v6e correctness or perf).
    if n_pad // tm < 2 and tm >= 2 * LANE:
        tm //= 2
    tk = _pick_tile(n_pad, COL_TILE)
    grid = (n_pad // tm, n_pad // tk)

    project_first = d_out < d_in
    if project_first:
        # Hoist X @ W_l out of the k-loop: computed once (plain-JAX glue, bf16)
        # instead of once per row tile, and the neighbor stream narrows to d_out.
        x_neigh = jnp.dot(x, w_l,
                          preferred_element_type=jnp.float32).astype(jnp.bfloat16)
        acc_cols = d_out
        kernel = functools.partial(_sage_agg_preprojected_kernel,
                                   apply_relu=apply_relu)
        inputs = (a_count, deg_inv, x_neigh, x, w_r, b)
        in_specs = [
            pl.BlockSpec((tm, tk), lambda i, k: (i, k)),        # A_count tile
            pl.BlockSpec((tm, 1), lambda i, k: (i, 0)),         # 1/deg rows
            pl.BlockSpec((tk, d_out), lambda i, k: (k, 0)),     # X @ Wl (neigh)
            pl.BlockSpec((tm, d_in), lambda i, k: (i, 0)),      # root feats
            pl.BlockSpec((d_in, d_out), lambda i, k: (0, 0)),   # W_r
            pl.BlockSpec((1, d_out), lambda i, k: (0, 0)),      # bias
        ]
    else:
        acc_cols = d_in
        kernel = functools.partial(_sage_agg_project_kernel,
                                   apply_relu=apply_relu)
        inputs = (a_count, deg_inv, x, x, w_l, w_r, b)          # x passed twice
        in_specs = [
            pl.BlockSpec((tm, tk), lambda i, k: (i, k)),        # A_count tile
            pl.BlockSpec((tm, 1), lambda i, k: (i, 0)),         # 1/deg rows
            pl.BlockSpec((tk, d_in), lambda i, k: (k, 0)),      # neighbor feats
            pl.BlockSpec((tm, d_in), lambda i, k: (i, 0)),      # root feats
            pl.BlockSpec((d_in, d_out), lambda i, k: (0, 0)),   # W_l
            pl.BlockSpec((d_in, d_out), lambda i, k: (0, 0)),   # W_r
            pl.BlockSpec((1, d_out), lambda i, k: (0, 0)),      # bias
        ]

    return pl.pallas_call(
        kernel,
        out_shape=jax.ShapeDtypeStruct((n_pad, d_out), out_dtype),
        grid_spec=pltpu.PrefetchScalarGridSpec(
            num_scalar_prefetch=0,
            grid=grid,
            in_specs=in_specs,
            out_specs=pl.BlockSpec((tm, d_out), lambda i, k: (i, 0)),
            scratch_shapes=[pltpu.VMEM((tm, acc_cols), jnp.float32)],
        ),
        compiler_params=pltpu.CompilerParams(
            dimension_semantics=("parallel", "arbitrary")),
    )(*inputs)


# ---------------------------------------------------------------------------
# Graph preprocessing (plain-JAX glue) + model forward
# ---------------------------------------------------------------------------

def build_count_adjacency(edge_index, num_nodes, num_nodes_pad):
    """int8 in-edge counts A[i,j] = #edges (j->i), plus exact f32 1/deg_in rows."""
    # TODO(synk): for large sparse graphs replace this dense O(N^2) matrix with a
    # scalar-prefetched CSR gather kernel (PrefetchScalarGridSpec index_map).
    # TODO(synk): int8 counts assume per-pair edge multiplicity <= 127.
    src, dst = edge_index[0], edge_index[1]
    counts = jnp.zeros((num_nodes, num_nodes), jnp.int32).at[dst, src].add(1)
    deg = counts.sum(axis=1)
    deg_inv = jnp.where(deg > 0, 1.0 / jnp.maximum(deg, 1).astype(jnp.float32),
                        0.0)
    pad = num_nodes_pad - num_nodes
    a8 = jnp.pad(counts, ((0, pad), (0, pad))).astype(jnp.int8)
    deg_inv_p = jnp.pad(deg_inv, (0, pad)).reshape(num_nodes_pad, 1)
    return a8, deg_inv_p


def graphsage_forward(params, x, edge_index):
    """GraphSAGE.forward: sage1 -> relu -> dropout(eval, identity) -> sage2."""
    n, d_in = x.shape
    d_h = params["w_l1"].shape[1]
    d_out = params["w_l2"].shape[1]

    # Pad N only to lane granularity (128): A is N_pad x N_pad, so padding to
    # the tile size would cost quadratically in HBM bytes and MXU work.
    n_pad = _round_up(n, LANE)
    d_in_p, d_h_p, d_out_p = (_round_up(d, LANE) for d in (d_in, d_h, d_out))

    a8, deg_inv = build_count_adjacency(edge_index, n, n_pad)
    x_p = _pad2(x, n_pad, d_in_p).astype(jnp.bfloat16)

    # bf16 weights -> full-rate MXU + half the weight DMA; biases stay f32.
    wl1 = _pad2(params["w_l1"], d_in_p, d_h_p).astype(jnp.bfloat16)
    wr1 = _pad2(params["w_r1"], d_in_p, d_h_p).astype(jnp.bfloat16)
    b1 = _pad2(params["b1"], 1, d_h_p)
    wl2 = _pad2(params["w_l2"], d_h_p, d_out_p).astype(jnp.bfloat16)
    wr2 = _pad2(params["w_r2"], d_h_p, d_out_p).astype(jnp.bfloat16)
    b2 = _pad2(params["b2"], 1, d_out_p)

    h = sage_conv(a8, deg_inv, x_p, wl1, wr1, b1, apply_relu=True,
                  out_dtype=jnp.bfloat16)
    # dropout(p=0.5, training=False) -> identity (eval semantics)
    out = sage_conv(a8, deg_inv, h, wl2, wr2, b2, apply_relu=False,
                    out_dtype=jnp.float32)
    return out[:n, :d_out]


def init_params(key, dim_in, dim_h, dim_out):
    """Deterministic glorot-ish init matching SAGEConv parameter shapes."""
    ks = jax.random.split(key, 6)

    def glorot(k, fan_in, fan_out):
        lim = (6.0 / (fan_in + fan_out)) ** 0.5
        return jax.random.uniform(k, (fan_in, fan_out), jnp.float32, -lim, lim)

    return {
        # layer 1: lin_l (neighbors, carries the bias), lin_r (root, no bias)
        "w_l1": glorot(ks[0], dim_in, dim_h),
        "w_r1": glorot(ks[1], dim_in, dim_h),
        "b1": jax.random.uniform(ks[2], (1, dim_h), jnp.float32, -0.1, 0.1),
        # layer 2
        "w_l2": glorot(ks[3], dim_h, dim_out),
        "w_r2": glorot(ks[4], dim_h, dim_out),
        "b2": jax.random.uniform(ks[5], (1, dim_out), jnp.float32, -0.1, 0.1),
    }


if __name__ == "__main__":
    key = jax.random.PRNGKey(0)
    k_x, k_e, k_p = jax.random.split(key, 3)

    num_nodes, num_edges = 64, 256
    dim_in, dim_h, dim_out = 16, 32, 8

    x = jax.random.normal(k_x, (num_nodes, dim_in), jnp.float32)
    edge_index = jax.random.randint(k_e, (2, num_edges), 0, num_nodes, jnp.int32)

    params = init_params(k_p, dim_in, dim_h, dim_out)

    out = graphsage_forward(params, x, edge_index)
    out = jax.block_until_ready(out)

    # Pure-JAX f32 reference (eval-mode GraphSAGE) for a tolerance check
    # (kernel uses bf16 weights/activations with f32 accumulation).
    adj = jnp.zeros((num_nodes, num_nodes), jnp.float32).at[
        edge_index[1], edge_index[0]].add(1.0)
    a_f32 = adj / jnp.maximum(adj.sum(axis=1, keepdims=True), 1.0)
    h_ref = jnp.maximum(
        (a_f32 @ x) @ params["w_l1"] + x @ params["w_r1"] + params["b1"], 0.0)
    out_ref = ((a_f32 @ h_ref) @ params["w_l2"] + h_ref @ params["w_r2"]
               + params["b2"])

    assert out.shape == (num_nodes, dim_out), out.shape
    assert out.dtype == jnp.float32
    assert bool(jnp.all(jnp.isfinite(out)))
    err = float(jnp.max(jnp.abs(out - out_ref)))
    tol = 0.1 * (float(jnp.max(jnp.abs(out_ref))) + 1.0)
    assert err < tol, f"max |out - ref| = {err} exceeds tol {tol}"
    print("KERNEL_OK")
</pallas_src>

<mosaic_0001>
module attributes {stable_mosaic.version = 11 : i64} {
  func.func @_sage_agg_project_kernel(%arg0: i32, %arg1: i32, %arg2: memref<128x128xi8, #tpu.memory_space<vmem>>, %arg3: memref<128x1xf32, #tpu.memory_space<vmem>>, %arg4: memref<128x128xbf16, #tpu.memory_space<vmem>>, %arg5: memref<128x128xbf16, #tpu.memory_space<vmem>>, %arg6: memref<128x128xbf16, #tpu.memory_space<vmem>>, %arg7: memref<128x128xbf16, #tpu.memory_space<vmem>>, %arg8: memref<1x128xf32, #tpu.memory_space<vmem>>, %arg9: memref<128x128xbf16, #tpu.memory_space<vmem>>, %arg10: memref<128x128xf32, #tpu.memory_space<vmem>>) attributes {dimension_semantics = [#tpu.dimension_semantics<parallel>, #tpu.dimension_semantics<arbitrary>], iteration_bounds = array<i64: 1, 1>, scalar_prefetch = 0 : i64, scratch_operands = 1 : i64, tpu.core_type = #tpu.core_type<tc>, window_params = [{transform_indices = @transform_0, window_bounds = array<i64: 128, 128>}, {transform_indices = @transform_1, window_bounds = array<i64: 128, 1>}, {transform_indices = @transform_2, window_bounds = array<i64: 128, 128>}, {transform_indices = @transform_3, window_bounds = array<i64: 128, 128>}, {pipeline_mode = #tpu.pipeline_mode<synchronous>, transform_indices = @transform_4, window_bounds = array<i64: 128, 128>}, {pipeline_mode = #tpu.pipeline_mode<synchronous>, transform_indices = @transform_5, window_bounds = array<i64: 128, 128>}, {pipeline_mode = #tpu.pipeline_mode<synchronous>, transform_indices = @transform_6, window_bounds = array<i64: 1, 128>}, {transform_indices = @transform_7, window_bounds = array<i64: 128, 128>}]} {
    %c0_i32 = arith.constant 0 : i32
    %0 = arith.cmpi eq, %arg1, %c0_i32 : i32
    %1 = arith.extui %0 : i1 to i32
    %c0_i32_0 = arith.constant 0 : i32
    %2 = arith.cmpi ne, %1, %c0_i32_0 : i32
    scf.if %2 {
      %cst_10 = arith.constant 0.000000e+00 : f32
      %13 = vector.broadcast %cst_10 : f32 to vector<128x128xf32>
      %c0_11 = arith.constant 0 : index
      %c0_12 = arith.constant 0 : index
      %14 = vector.load %arg10[%c0_11, %c0_12] : memref<128x128xf32, #tpu.memory_space<vmem>>, vector<128x128xf32>
      tpu.vector_store %arg10[%c0_11, %c0_12], %13 {strides = array<i32>} : memref<128x128xf32, #tpu.memory_space<vmem>>, vector<128x128xf32>,
    } else {
    }
    %c0 = arith.constant 0 : index
    %c0_1 = arith.constant 0 : index
    %3 = vector.load %arg2[%c0, %c0_1] : memref<128x128xi8, #tpu.memory_space<vmem>>, vector<128x128xi8>
    %4 = arith.sitofp %3 : vector<128x128xi8> to vector<128x128xbf16>
    %c0_2 = arith.constant 0 : index
    %c0_3 = arith.constant 0 : index
    %5 = vector.load %arg10[%c0_2, %c0_3] : memref<128x128xf32, #tpu.memory_space<vmem>>, vector<128x128xf32>
    %c0_4 = arith.constant 0 : index
    %c0_5 = arith.constant 0 : index
    %6 = vector.load %arg4[%c0_4, %c0_5] : memref<128x128xbf16, #tpu.memory_space<vmem>>, vector<128x128xbf16>
    %cst = arith.constant dense<0.000000e+00> : vector<128x128xf32>
    %7 = tpu.matmul %4, %6, %cst {dimension_numbers = #tpu.dot_dimension_numbers<[1], [0], [0], [1], [0, 0, 1, 1], [], []>} : vector<128x128xbf16>, vector<128x128xbf16>, vector<128x128xf32> -> vector<128x128xf32>
    %8 = arith.addf %5, %7 : vector<128x128xf32>
    %c0_6 = arith.constant 0 : index
    %c0_7 = arith.constant 0 : index
    %9 = vector.load %arg10[%c0_6, %c0_7] : memref<128x128xf32, #tpu.memory_space<vmem>>, vector<128x128xf32>
    tpu.vector_store %arg10[%c0_6, %c0_7], %8 {strides = array<i32>} : memref<128x128xf32, #tpu.memory_space<vmem>>, vector<128x128xf32>,
    %c0_i32_8 = arith.constant 0 : i32
    %10 = arith.cmpi eq, %arg1, %c0_i32_8 : i32
    %11 = arith.extui %10 : i1 to i32
    %c0_i32_9 = arith.constant 0 : i32
    %12 = arith.cmpi ne, %11, %c0_i32_9 : i32
    scf.if %12 {
      %c0_10 = arith.constant 0 : index
      %c0_11 = arith.constant 0 : index
      %13 = vector.load %arg10[%c0_10, %c0_11] : memref<128x128xf32, #tpu.memory_space<vmem>>, vector<128x128xf32>
      %c0_12 = arith.constant 0 : index
      %c0_13 = arith.constant 0 : index
      %14 = vector.load %arg3[%c0_12, %c0_13] : memref<128x1xf32, #tpu.memory_space<vmem>>, vector<128x1xf32>
      %15 = vector.broadcast %14 : vector<128x1xf32> to vector<128x128xf32>
      %16 = arith.mulf %13, %15 : vector<128x128xf32>
      %17 = arith.truncf %16 : vector<128x128xf32> to vector<128x128xbf16>
      %c0_14 = arith.constant 0 : index
      %c0_15 = arith.constant 0 : index
      %18 = vector.load %arg6[%c0_14, %c0_15] : memref<128x128xbf16, #tpu.memory_space<vmem>>, vector<128x128xbf16>
      %cst_16 = arith.constant dense<0.000000e+00> : vector<128x128xf32>
      %19 = tpu.matmul %17, %18, %cst_16 {dimension_numbers = #tpu.dot_dimension_numbers<[1], [0], [0], [1], [0, 0, 1, 1], [], []>} : vector<128x128xbf16>, vector<128x128xbf16>, vector<128x128xf32> -> vector<128x128xf32>
      %c0_17 = arith.constant 0 : index
      %c0_18 = arith.constant 0 : index
      %20 = vector.load %arg5[%c0_17, %c0_18] : memref<128x128xbf16, #tpu.memory_space<vmem>>, vector<128x128xbf16>
      %c0_19 = arith.constant 0 : index
      %c0_20 = arith.constant 0 : index
      %21 = vector.load %arg7[%c0_19, %c0_20] : memref<128x128xbf16, #tpu.memory_space<vmem>>, vector<128x128xbf16>
      %cst_21 = arith.constant dense<0.000000e+00> : vector<128x128xf32>
      %22 = tpu.matmul %20, %21, %cst_21 {dimension_numbers = #tpu.dot_dimension_numbers<[1], [0], [0], [1], [0, 0, 1, 1], [], []>} : vector<128x128xbf16>, vector<128x128xbf16>, vector<128x128xf32> -> vector<128x128xf32>
      %23 = arith.addf %19, %22 : vector<128x128xf32>
      %c0_22 = arith.constant 0 : index
      %c0_23 = arith.constant 0 : index
      %24 = vector.load %arg8[%c0_22, %c0_23] : memref<1x128xf32, #tpu.memory_space<vmem>>, vector<1x128xf32>
      %25 = vector.broadcast %24 : vector<1x128xf32> to vector<128x128xf32>
      %26 = arith.addf %23, %25 : vector<128x128xf32>
      %cst_24 = arith.constant 0.000000e+00 : f32
      %27 = vector.broadcast %cst_24 : f32 to vector<128x128xf32>
      %28 = arith.maximumf %26, %27 : vector<128x128xf32>
      %29 = arith.truncf %28 : vector<128x128xf32> to vector<128x128xbf16>
      %c0_25 = arith.constant 0 : index
      %c0_26 = arith.constant 0 : index
      %30 = vector.load %arg9[%c0_25, %c0_26] : memref<128x128xbf16, #tpu.memory_space<vmem>>, vector<128x128xbf16>
      tpu.vector_store %arg9[%c0_25, %c0_26], %29 {strides = array<i32>} : memref<128x128xbf16, #tpu.memory_space<vmem>>, vector<128x128xbf16>,
    } else {
    }
    return
  }
  func.func @transform_0(%arg0: i32, %arg1: i32) -> (i32, i32) {
    %c0_i32 = arith.constant 0 : i32
    return %arg0, %arg1 : i32, i32
  }
  func.func @transform_1(%arg0: i32, %arg1: i32) -> (i32, i32) {
    %c0_i32 = arith.constant 0 : i32
    %c0_i32_0 = arith.constant 0 : i32
    return %arg0, %c0_i32 : i32, i32
  }
  func.func @transform_2(%arg0: i32, %arg1: i32) -> (i32, i32) {
    %c0_i32 = arith.constant 0 : i32
    %c0_i32_0 = arith.constant 0 : i32
    return %arg1, %c0_i32 : i32, i32
  }
  func.func @transform_3(%arg0: i32, %arg1: i32) -> (i32, i32) {
    %c0_i32 = arith.constant 0 : i32
    %c0_i32_0 = arith.constant 0 : i32
    return %arg0, %c0_i32 : i32, i32
  }
  func.func @transform_4(%arg0: i32, %arg1: i32) -> (i32, i32) {
    %c0_i32 = arith.constant 0 : i32
    %c0_i32_0 = arith.constant 0 : i32
    %c0_i32_1 = arith.constant 0 : i32
    return %c0_i32, %c0_i32_0 : i32, i32
  }
  func.func @transform_5(%arg0: i32, %arg1: i32) -> (i32, i32) {
    %c0_i32 = arith.constant 0 : i32
    %c0_i32_0 = arith.constant 0 : i32
    %c0_i32_1 = arith.constant 0 : i32
    return %c0_i32, %c0_i32_0 : i32, i32
  }
  func.func @transform_6(%arg0: i32, %arg1: i32) -> (i32, i32) {
    %c0_i32 = arith.constant 0 : i32
    %c0_i32_0 = arith.constant 0 : i32
    %c0_i32_1 = arith.constant 0 : i32
    return %c0_i32, %c0_i32_0 : i32, i32
  }
  func.func @transform_7(%arg0: i32, %arg1: i32) -> (i32, i32) {
    %c0_i32 = arith.constant 0 : i32
    %c0_i32_0 = arith.constant 0 : i32
    return %arg0, %c0_i32 : i32, i32
  }
}

</mosaic_0001>

<bundles_post_ra>
// kernel: tpu_custom_call.1
= control target key start
LH: loop header
LB: loop body
LE: loop exit
PB: predicated region body
PF: predicated region fallthrough
CT: control target
= control target key end

     0   :  { %12 = vsyncpa [#allocation4], 0  ;;  %s1564_s0 = inlined_call_operand.hbm [shape: s8[128,128], index: 0, kind: input, shape index: {}]   ;;  %s1565_s1 = inlined_call_operand.vmem [shape: f32[128,1], index: 1, kind: input, shape index: {}]   ;;  %s1566_s2 = inlined_call_operand.vmem [shape: bf16[128,128], index: 2, kind: input, shape index: {}]   ;;  %s1567_s3 = inlined_call_operand.vmem [shape: bf16[128,128], index: 3, kind: input, shape index: {}]   ;;  %s1568_s4 = inlined_call_operand.hbm [shape: bf16[128,128], index: 4, kind: input, shape index: {}]   ;;  %s1569_s5 = inlined_call_operand.hbm [shape: bf16[128,128], index: 5, kind: input, shape index: {}]   ;;  %s1570_s6 = inlined_call_operand.vmem [shape: f32[1,128], index: 6, kind: input, shape index: {}]   ;;  %s1571_s7 = inlined_call_operand.hbm [shape: bf16[128,128], index: 7, kind: output, shape index: {}]  }
   0x1   :  { %13 = vsyncpa [#allocation7], 0 }
   0x2   :  { %14 = vsyncpa [#allocation5], 0  ;;  %s1373_s24 = smov [#allocation6]  }
   0x3   :  { %s38_s25 = sshll.u32 %s1373_s24, 4  ;;  %s39_s25 = int_to_ptr.vmem [resolvable:$true] %s38_s25 }
   0x4   :  { %s1295_s26 = scalar_lea.vmem %s39_s25, 1024  ;;  %p1300_p1 = scmp.lt.s32.totalorder %s39_s25, %s39_s25 }
   0x5   :  { %p1296_p0 = scmp.ne.s32.totalorder %s39_s25, %s1295_s26  ;;  %p1301_p2 = scmp.lt.s32.totalorder %s1295_s26, %s1295_s26 }
   0x7   :  { %p1302_p3 = por %p1301_p2, %p1300_p1 }
   0x9   :  { %p1303_p4 = pnand %p1302_p3, %p1296_p0 }
   0xb   :  { %1306 = shalt.err (!%p1303_p4)
}
   0xc   :  { %s1374_s27 = smov 64   ;;  %s1375_s28 = smov 4  }
   0xd   :  { %44 = dma.hbm_to_vmem [thread:$0]  %s1568_s4, 1024, %s39_s25, [#allocation7], %s1374_s27, %s1374_s27, %s1375_s28  }
   0xe   :  { %s1376_s8 = smov [#allocation3]  }
   0xf   :  { %s20_s9 = sshll.u32 %s1376_s8, 4  ;;  %s21_s9 = int_to_ptr.vmem [resolvable:$true] %s20_s9 }
  0x10   :  { %s1315_s10 = scalar_lea.vmem %s21_s9, 512  ;;  %p1320_p6 = scmp.lt.s32.totalorder %s21_s9, %s21_s9 }
  0x11   :  { %p1316_p5 = scmp.ne.s32.totalorder %s21_s9, %s1315_s10  ;;  %p1321_p7 = scmp.lt.s32.totalorder %s1315_s10, %s1315_s10 }
  0x13   :  { %p1322_p8 = por %p1321_p7, %p1320_p6 }
  0x15   :  { %p1323_p9 = pnand %p1322_p8, %p1316_p5 }
  0x17   :  { %1326 = shalt.err (!%p1323_p9)
}
  0x18   :  { %s1377_s11 = smov 128   ;;  %s1378_s12 = smov 8  }
  0x19   :  { %26 = dma.hbm_to_vmem [thread:$0]  %s1564_s0, 512, %s21_s9, [#allocation4], %s1377_s11, %s1377_s11, %s1378_s12  }
  0x1a   :  { %s1379_s15 = smov [#allocation8]  }
  0x1b   :  { %s50_s16 = sshll.u32 %s1379_s15, 4  ;;  %s51_s16 = int_to_ptr.vmem [resolvable:$true] %s50_s16 }
  0x1c   :  { %s1335_s4 = scalar_lea.vmem %s51_s16, 1024  ;;  %p1340_p11 = scmp.lt.s32.totalorder %s51_s16, %s51_s16 }
  0x1d   :  { %p1336_p10 = scmp.ne.s32.totalorder %s51_s16, %s1335_s4  ;;  %p1341_p12 = scmp.lt.s32.totalorder %s1335_s4, %s1335_s4 }
  0x1f   :  { %p1342_p13 = por %p1341_p12, %p1340_p11 }
  0x21   :  { %p1343_p0 = pnand %p1342_p13, %p1336_p10 }
  0x23   :  { %1346 = shalt.err (!%p1343_p0)
}
  0x24   :  { %56 = dma.hbm_to_vmem [thread:$0]  %s1569_s5, 1024, %s51_s16, [#allocation7], %s1374_s27, %s1374_s27, %s1375_s28  }
  0x25   :  { %1367 = dma.done.wait [#allocation4], 512  }
  0x26   :  { %1368 = vsyncadd [#allocation4], 4294966784 }
  0x27   :  { %1369 = dma.done.wait [#allocation7], 2048  }
  0x28   :  { %1370 = vsyncadd [#allocation7], 4294965248  ;;  %v1380_v0 = vmov 0   ;;  %v1255_v1 = vld [vmem:[%s1566_s2 + $0x38] sm:$0xff]   ;;  %v1256_v2 = vld [vmem:[%s1566_s2 + $0x30] sm:$0xff]  }
  0x29   :  { %1254 = vset.pattern.permute.xlu1 %v1380_v0  ;;  %1253 = vset.pattern.permute.xlu0 %v1380_v0  ;;  %v1257_v3 = vld [vmem:[%s1566_s2 + $0x28] sm:$0xff]   ;;  %v1258_v4 = vld [vmem:[%s1566_s2 + $0x20] sm:$0xff]   ;;  %v1259_v11 = vld [vmem:[%s1566_s2 + $0x18] sm:$0xff]  }
  0x2a   :  { %1132 = vmatprep.subr.bf16.mxu0 %v1255_v1  ;;  %v1449_v5 = vld [vmem:[#allocation3] sm:$0xff]  ;;  %v338_v9 = vld [vmem:[%s1565_s1 + $0x48] sm:$0xff]  ;;  %v1260_v12 = vld [vmem:[%s1566_s2 + $0x10] sm:$0xff]  }
  0x2b   :  { %1133 = vmatpush3.bf16.msra.mxu0 %v1255_v1  ;;  %v93_v6 = vunpack.c.l.s8.bf16 %v1449_v5  ;;  %v337_v7 = vld [vmem:[%s1565_s1 + $0x40] sm:$0xff]  ;;  %v330_v10 = vld [vmem:[%s1565_s1 + $0x8] sm:$0xff]  ;;  %v332_v13 = vld [vmem:[%s1565_s1 + $0x18] sm:$0xff]  ;;  %v94_v32 = vunpack.c.h.s8.bf16 %v1449_v5 }
  0x2c   :  { %1134 = vmatprep.subr.bf16.mxu0 %v1256_v2  ;;  %v329_v8 = vld [vmem:[%s1565_s1] sm:$0xff]  ;;  %387 = vperm.xlu1 %1254, %v337_v7   ;;  %v331_v14 = vld [vmem:[%s1565_s1 + $0x10] sm:$0xff]  ;;  %v1263_v15 = vld [vmem:[#allocation8 + $0x38] sm:$0xff]  }
  0x2d   :  { %347 = vperm.xlu0 %1253, %v329_v8   ;;  %1148 = vmatprep.mubr.bf16.mxu0 %v93_v6  ;;  %v1264_v16 = vld [vmem:[#allocation8 + $0x30] sm:$0xff]   ;;  %v1261_v17 = vld [vmem:[%s1566_s2 + $0x8] sm:$0xff]   ;;  %v340_v18 = vld [vmem:[%s1565_s1 + $0x58] sm:$0xff] }
  0x2e   :  { %1164 = vmatprep.subr.bf16.mxu1 %v1263_v15  ;;  %v339_v19 = vld [vmem:[%s1565_s1 + $0x50] sm:$0xff]  ;;  %v1265_v20 = vld [vmem:[#allocation8 + $0x28] sm:$0xff]   ;;  %v1262_v21 = vld [vmem:[%s1566_s2] sm:$0xff]  }
  0x2f   :  { %1135 = vmatpush3.bf16.msra.mxu0 %v1256_v2  ;;  %1165 = vmatpush3.bf16.msra.mxu1 %v1263_v15  ;;  %v334_v22 = vld [vmem:[%s1565_s1 + $0x28] sm:$0xff]  ;;  %v333_v23 = vld [vmem:[%s1565_s1 + $0x20] sm:$0xff]  ;;  %v1267_v29 = vld [vmem:[#allocation8 + $0x18] sm:$0xff]  }
  0x30   :  { %1136 = vmatprep.subr.bf16.mxu0 %v1257_v3  ;;  %392 = vperm.xlu1 %1254, %v338_v9   ;;  %v1266_v24 = vld [vmem:[#allocation8 + $0x20] sm:$0xff]   ;;  %v342_v25 = vld [vmem:[%s1565_s1 + $0x68] sm:$0xff]  ;;  %v1269_v30 = vld [vmem:[#allocation6 + $0x38] sm:$0xff]  }
  0x31   :  { %352 = vperm.xlu0 %1253, %v330_v10   ;;  %1166 = vmatprep.subr.bf16.mxu1 %v1264_v16  ;;  %v341_v26 = vld [vmem:[%s1565_s1 + $0x60] sm:$0xff]  ;;  %v90_v27 = vld [vmem:[#allocation3 + $0x8] sm:$0xff]  ;;  %v336_v31 = vld [vmem:[%s1565_s1 + $0x38] sm:$0xff] }
  0x32   :  { %v1274_v28 = vld [vmem:[%s1567_s3] sm:$0xff]   ;;  %v335_v33 = vld [vmem:[%s1565_s1 + $0x30] sm:$0xff]  ;;  %v95_v34 = vunpack.c.l.s8.bf16 %v90_v27  ;;  %v344_v37 = vld [vmem:[%s1565_s1 + $0x78] sm:$0xff]  ;;  %v96_v42 = vunpack.c.h.s8.bf16 %v90_v27 }
  0x33   :  { %1137 = vmatpush3.bf16.msra.mxu0 %v1257_v3  ;;  %1167 = vmatpush3.bf16.msra.mxu1 %v1264_v16  ;;  %v1268_v35 = vld [vmem:[#allocation8 + $0x10] sm:$0xff]   ;;  %v1270_v40 = vld [vmem:[#allocation8 + $0x8] sm:$0xff]   ;;  %v1272_v44 = vld [vmem:[#allocation8] sm:$0xff]  }
  0x34   :  { %1138 = vmatprep.subr.bf16.mxu0 %v1258_v4  ;;  %362 = vperm.xlu1 %1254, %v332_v13   ;;  %v1271_v36 = vld [vmem:[#allocation6 + $0x30] sm:$0xff]   ;;  %v1273_v41 = vld [vmem:[#allocation6 + $0x28] sm:$0xff]   ;;  %v1276_v45 = vld [vmem:[#allocation6 + $0x20] sm:$0xff]  }
  0x35   :  { %357 = vperm.xlu0 %1253, %v331_v14   ;;  %1168 = vmatprep.subr.bf16.mxu1 %v1265_v20  ;;  %v91_v38 = vld [vmem:[#allocation3 + $0x10] sm:$0xff]  ;;  %v92_v46 = vld [vmem:[#allocation3 + $0x18] sm:$0xff]  ;;  %v1275_v50 = vld [vmem:[%s1567_s3 + $0x8] sm:$0xff]  }
  0x36   :  { %1180 = vmatprep.mubr.bf16.mxu1 %v1274_v28  ;;  %v343_v39 = vld [vmem:[%s1565_s1 + $0x70] sm:$0xff]  ;;  %v97_v43 = vunpack.c.l.s8.bf16 %v91_v38  ;;  %v1277_v47 = vld [vmem:[#allocation6 + $0x18] sm:$0xff]   ;;  %v98_v48 = vunpack.c.h.s8.bf16 %v91_v38  ;;  %v99_v49 = vunpack.c.l.s8.bf16 %v92_v46  ;;  %v100_v52 = vunpack.c.h.s8.bf16 %v92_v46  ;;  %v1281_v55 = vld [vmem:[#allocation6 + $0x8] sm:$0xff]  }
  0x37   :  { %1139 = vmatpush3.bf16.msra.mxu0 %v1258_v4  ;;  %1169 = vmatpush3.bf16.msra.mxu1 %v1265_v20  ;;  %v1278_v51 = vld [vmem:[%s1567_s3 + $0x10] sm:$0xff]   ;;  %v1279_v53 = vld [vmem:[%s1567_s3 + $0x18] sm:$0xff]   ;;  %v1282_v56 = vld [vmem:[%s1567_s3 + $0x20] sm:$0xff]  }
  0x38   :  { %1140 = vmatprep.subr.bf16.mxu0 %v1259_v11  ;;  %402 = vperm.xlu1 %1254, %v340_v18   ;;  %v1280_v54 = vld [vmem:[#allocation6 + $0x10] sm:$0xff]   ;;  %v1283_v57 = vld [vmem:[%s1567_s3 + $0x28] sm:$0xff]   ;;  %v1284_v58 = vld [vmem:[#allocation6] sm:$0xff]  }
  0x39   :  { %397 = vperm.xlu0 %1253, %v339_v19   ;;  %1170 = vmatprep.subr.bf16.mxu1 %v1266_v24  ;;  %v1285_v59 = vld [vmem:[%s1567_s3 + $0x30] sm:$0xff]   ;;  %v1286_v60 = vld [vmem:[%s1567_s3 + $0x38] sm:$0xff]  }
  0x3b   :  { %1141 = vmatpush3.bf16.msra.mxu0 %v1259_v11  ;;  %1171 = vmatpush3.bf16.msra.mxu1 %v1266_v24 }
  0x3c   :  { %1142 = vmatprep.subr.bf16.mxu0 %v1260_v12  ;;  %372 = vperm.xlu1 %1254, %v334_v22  }
  0x3d   :  { %367 = vperm.xlu0 %1253, %v333_v23   ;;  %1172 = vmatprep.subr.bf16.mxu1 %v1267_v29 }
  0x3f   :  { %1143 = vmatpush3.bf16.msra.mxu0 %v1260_v12  ;;  %1173 = vmatpush3.bf16.msra.mxu1 %v1267_v29 }
  0x40   :  { %1144 = vmatprep.subr.bf16.mxu0 %v1261_v17  ;;  %412 = vperm.xlu1 %1254, %v342_v25  }
  0x41   :  { %407 = vperm.xlu0 %1253, %v341_v26   ;;  %1174 = vmatprep.subr.bf16.mxu1 %v1268_v35 }
  0x43   :  { %1145 = vmatpush3.bf16.msra.mxu0 %v1261_v17  ;;  %1175 = vmatpush3.bf16.msra.mxu1 %v1268_v35 }
  0x44   :  { %1146 = vmatprep.subr.bf16.mxu0 %v1262_v21  ;;  %382 = vperm.xlu1 %1254, %v336_v31  }
  0x45   :  { %377 = vperm.xlu0 %1253, %v335_v33   ;;  %1176 = vmatprep.subr.bf16.mxu1 %v1270_v40 }
  0x47   :  { %1147 = vmatpush3.bf16.msra.mxu0 %v1262_v21  ;;  %1177 = vmatpush3.bf16.msra.mxu1 %v1270_v40 }
  0x48   :  { %1196 = vmatprep.subr.bf16.mxu0 %v1269_v30  ;;  %422 = vperm.xlu1 %1254, %v344_v37  }
  0x49   :  { %417 = vperm.xlu0 %1253, %v343_v39   ;;  %1178 = vmatprep.subr.bf16.mxu1 %v1272_v44 }
  0x4a   :  { %1149 = vmatmul.mubr.bf16.vlgmr.msra.gmra.mxu0 %v94_v32 }
  0x4b   :  { %1152 = vmatprep.mubr.bf16.mxu0 %v95_v34  ;;  %1197 = vmatpush3.bf16.msra.mxu0 %v1269_v30 }
  0x4c   :  { %1198 = vmatprep.subr.bf16.mxu0 %v1271_v36  ;;  %1179 = vmatpush3.bf16.msra.mxu1 %v1272_v44 }
  0x4d   :  { %1228 = vmatprep.subr.bf16.mxu1 %v1269_v30 }
  0x4f   :  { %1199 = vmatpush3.bf16.msra.mxu0 %v1271_v36  ;;  %1181 = vmatmul.mubr.bf16.vlgmr.msra.gmra.mxu1 %v1275_v50 }
  0x50   :  { %1200 = vmatprep.subr.bf16.mxu0 %v1273_v41  ;;  %1236 = vmatpush3.bf16.msra.mxu1 %v1269_v30 }
  0x51   :  { %1184 = vmatprep.mubr.bf16.mxu1 %v1278_v51  ;;  %1229 = vmatprep.subr.bf16.mxu1 %v1271_v36 }
  0x52   :  { %1153 = vmatmul.mubr.bf16.gmra.mxu0 %v96_v42 }
  0x53   :  { %1156 = vmatprep.mubr.bf16.mxu0 %v97_v43  ;;  %1201 = vmatpush3.bf16.msra.mxu0 %v1273_v41 }
  0x54   :  { %1202 = vmatprep.subr.bf16.mxu0 %v1276_v45  ;;  %1237 = vmatpush3.bf16.msra.mxu1 %v1271_v36 }
  0x55   :  { %1230 = vmatprep.subr.bf16.mxu1 %v1273_v41 }
  0x57   :  { %1203 = vmatpush3.bf16.msra.mxu0 %v1276_v45  ;;  %1185 = vmatmul.mubr.bf16.gmra.mxu1 %v1279_v53 }
  0x58   :  { %1204 = vmatprep.subr.bf16.mxu0 %v1277_v47  ;;  %1238 = vmatpush3.bf16.msra.mxu1 %v1273_v41 }
  0x59   :  { %1231 = vmatprep.subr.bf16.mxu1 %v1276_v45  ;;  %1188 = vmatprep.mubr.bf16.mxu1 %v1282_v56 }
  0x5a   :  { %1157 = vmatmul.mubr.bf16.gmra.mxu0 %v98_v48 }
  0x5b   :  { %1160 = vmatprep.mubr.bf16.mxu0 %v99_v49  ;;  %1205 = vmatpush3.bf16.msra.mxu0 %v1277_v47 }
  0x5c   :  { %1239 = vmatpush3.bf16.msra.mxu1 %v1276_v45  ;;  %1206 = vmatprep.subr.bf16.mxu0 %v1280_v54 }
  0x5d   :  { %1232 = vmatprep.subr.bf16.mxu1 %v1277_v47 }
  0x5f   :  { %1207 = vmatpush3.bf16.msra.mxu0 %v1280_v54  ;;  %1189 = vmatmul.mubr.bf16.gmra.mxu1 %v1283_v57 }
  0x60   :  { %1240 = vmatpush3.bf16.msra.mxu1 %v1277_v47  ;;  %1208 = vmatprep.subr.bf16.mxu0 %v1281_v55 }
  0x61   :  { %1233 = vmatprep.subr.bf16.mxu1 %v1280_v54  ;;  %1192 = vmatprep.mubr.bf16.mxu1 %v1285_v59 }
  0x62   :  { %1161 = vmatmul.mubr.bf16.gmra.mxu0 %v100_v52 }
  0x63   :  { %1209 = vmatpush3.bf16.msra.mxu0 %v1281_v55 }
  0x64   :  { %1241 = vmatpush3.bf16.msra.mxu1 %v1280_v54  ;;  %1210 = vmatprep.subr.bf16.mxu0 %v1284_v58 }
  0x65   :  { %1234 = vmatprep.subr.bf16.mxu1 %v1281_v55 }
  0x67   :  { %1211 = vmatpush3.bf16.msra.mxu0 %v1284_v58  ;;  %1193 = vmatmul.mubr.bf16.gmra.mxu1 %v1286_v60 }
  0x68   :  { %1242 = vmatpush3.bf16.msra.mxu1 %v1281_v55 }
  0x69   :  { %1235 = vmatprep.subr.bf16.mxu1 %v1284_v58 }
  0x6c   :  { %1243 = vmatpush3.bf16.msra.mxu1 %v1284_v58 }
  0xa7   :  { %v388_v61 = vpop.permute.xlu1 %387 }
  0xa8   :  { %v348_v62 = vpop.permute.xlu0 %347 }
  0xab   :  { %v393_v63 = vpop.permute.xlu1 %392 }
  0xac   :  { %v353_v0 = vpop.permute.xlu0 %352 }
  0xaf   :  { %v363_v1 = vpop.permute.xlu1 %362 }
  0xb0   :  { %v358_v2 = vpop.permute.xlu0 %357 }
  0xb3   :  { %v403_v3 = vpop.permute.xlu1 %402 }
  0xb4   :  { %v398_v4 = vpop.permute.xlu0 %397 }
  0xb7   :  { %v373_v6 = vpop.permute.xlu1 %372 }
  0xb8   :  { %v368_v8 = vpop.permute.xlu0 %367 }
  0xbb   :  { %v413_v12 = vpop.permute.xlu1 %412 }
  0xbc   :  { %v408_v17 = vpop.permute.xlu0 %407 }
  0xbf   :  { %v383_v22 = vpop.permute.xlu1 %382 }
  0xc0   :  { %v378_v25 = vpop.permute.xlu0 %377 }
  0xc3   :  { %v423_v44 = vpop.permute.xlu1 %422 }
  0xc4   :  { %v418_v47 = vpop.permute.xlu0 %417 }
 0x10a   :  { %v1150_v5 = vpop.f32.mrf.mxu0 }
 0x10b   :  { %v427_v15 = vmul.f32 %v1150_v5, %v358_v2 }
 0x10c   :  { %v215_v7 = vpop.f32.mrf.mxu0 }
 0x10d   :  { %v425_v13 = vmul.f32 %v348_v62, %v215_v7 }
 0x10e   :  { %v1151_v9 = vpop.f32.mrf.mxu0 }
 0x10f   :  { %v428_v10 = vmul.f32 %v1151_v9, %v363_v1  ;;  %v1182_v53 = vpop.f32.mrf.mxu1 }
 0x110   :  { %v218_v11 = vpop.f32.mrf.mxu0 }
 0x111   :  { %v426_v14 = vmul.f32 %v353_v0, %v218_v11  ;;  %v442_v19 = vpack.c.bf16 %v428_v10, %v427_v15  ;;  %v627_v54 = vpop.f32.mrf.mxu1 }
 0x112   :  { %v1154_v16 = vpop.f32.mrf.mxu0 }
 0x113   :  { %v441_v18 = vpack.c.bf16 %v426_v14, %v425_v13  ;;  %v431_v28 = vmul.f32 %v1154_v16, %v378_v25  ;;  %v1183_v55 = vpop.f32.mrf.mxu1 }
 0x114   :  { %v231_v20 = vpop.f32.mrf.mxu0 }
 0x115   :  { %1212 = vmatprep.mubr.bf16.mxu0 %v441_v18  ;;  %v429_v26 = vmul.f32 %v368_v8, %v231_v20  ;;  %v630_v56 = vpop.f32.mrf.mxu1 }
 0x116   :  { %v1155_v21 = vpop.f32.mrf.mxu0  ;;  %1213 = vmatmul.mubr.bf16.vlgmr.msra.gmra.mxu0 %v442_v19 }
 0x117   :  { %v432_v23 = vmul.f32 %v1155_v21, %v383_v22  ;;  %v1186_v57 = vpop.f32.mrf.mxu1 }
 0x118   :  { %v234_v24 = vpop.f32.mrf.mxu0 }
 0x119   :  { %v430_v27 = vmul.f32 %v373_v6, %v234_v24  ;;  %v444_v31 = vpack.c.bf16 %v432_v23, %v431_v28  ;;  %v643_v58 = vpop.f32.mrf.mxu1 }
 0x11a   :  { %v1158_v29 = vpop.f32.mrf.mxu0 }
 0x11b   :  { %v443_v30 = vpack.c.bf16 %v430_v27, %v429_v26  ;;  %v435_v38 = vmul.f32 %v1158_v29, %v398_v4  ;;  %v1187_v59 = vpop.f32.mrf.mxu1 }
 0x11c   :  { %v247_v32 = vpop.f32.mrf.mxu0 }
 0x11d   :  { %1216 = vmatprep.mubr.bf16.mxu0 %v443_v30  ;;  %v433_v36 = vmul.f32 %v388_v61, %v247_v32  ;;  %v646_v60 = vpop.f32.mrf.mxu1 }
 0x11e   :  { %v1159_v33 = vpop.f32.mrf.mxu0  ;;  %1217 = vmatmul.mubr.bf16.gmra.mxu0 %v444_v31 }
 0x11f   :  { %v436_v34 = vmul.f32 %v1159_v33, %v403_v3  ;;  %v1190_v61 = vpop.f32.mrf.mxu1  ;;  %v1540_v3 = vld [vmem:[%s1570_s6] ss:$0 sm:$0xff]  ;;  %s1381_s6 = smov [#allocation9]  }
 0x120   :  { %v250_v35 = vpop.f32.mrf.mxu0  ;;  %s959_s10 = sshll.u32 %s1381_s6, 4  ;;  %s960_s10 = int_to_ptr.vmem [resolvable:$true] %s959_s10 }
 0x121   :  { %v434_v37 = vmul.f32 %v393_v63, %v250_v35  ;;  %v446_v41 = vpack.c.bf16 %v436_v34, %v435_v38  ;;  %v659_v62 = vpop.f32.mrf.mxu1  ;;  %s1347_s11 = scalar_lea.vmem %s960_s10, 1024  ;;  %p1352_p2 = scmp.lt.s32.totalorder %s960_s10, %s960_s10 }
 0x122   :  { %v1162_v39 = vpop.f32.mrf.mxu0  ;;  %p1348_p1 = scmp.ne.s32.totalorder %s960_s10, %s1347_s11  ;;  %p1353_p3 = scmp.lt.s32.totalorder %s1347_s11, %s1347_s11 }
 0x123   :  { %v445_v40 = vpack.c.bf16 %v434_v37, %v433_v36  ;;  %v439_v50 = vmul.f32 %v1162_v39, %v418_v47  ;;  %v1191_v63 = vpop.f32.mrf.mxu1 }
 0x124   :  { %v263_v42 = vpop.f32.mrf.mxu0  ;;  %p1354_p4 = por %p1353_p3, %p1352_p2 }
 0x125   :  { %1220 = vmatprep.mubr.bf16.mxu1 %v445_v40  ;;  %v437_v48 = vmul.f32 %v408_v17, %v263_v42  ;;  %v662_v0 = vpop.f32.mrf.mxu1 }
 0x126   :  { %v1163_v43 = vpop.f32.mrf.mxu0  ;;  %1221 = vmatmul.mubr.bf16.vlgmr.msra.gmra.mxu1 %v446_v41  ;;  %p1355_p5 = pnand %p1354_p4, %p1348_p1 }
 0x127   :  { %v440_v45 = vmul.f32 %v1163_v43, %v423_v44  ;;  %v1194_v4 = vpop.f32.mrf.mxu1 }
 0x128   :  { %v266_v46 = vpop.f32.mrf.mxu0 }
 0x129   :  { %v438_v49 = vmul.f32 %v413_v12, %v266_v46  ;;  %v448_v52 = vpack.c.bf16 %v440_v45, %v439_v50  ;;  %v675_v10 = vpop.f32.mrf.mxu1 }
 0x12b   :  { %v447_v51 = vpack.c.bf16 %v438_v49, %v437_v48  ;;  %v1195_v20 = vpop.f32.mrf.mxu1 }
 0x12d   :  { %1224 = vmatprep.mubr.bf16.mxu1 %v447_v51  ;;  %v678_v30 = vpop.f32.mrf.mxu1 }
 0x12e   :  { %1225 = vmatmul.mubr.bf16.gmra.mxu1 %v448_v52 }
 0x1d6   :  { %v1214_v1 = vpop.f32.mrf.mxu0 }
 0x1d7   :  { %v781_v2 = vadd.f32 %v1214_v1, %v1182_v53 }
 0x1d8   :  { %v772_v5 = vpop.f32.mrf.mxu0 }
 0x1d9   :  { %v773_v6 = vadd.f32 %v772_v5, %v627_v54  ;;  %v844_v8 = vadd.f32 %v1540_v3, %v781_v2 }
 0x1da   :  { %v1215_v7 = vpop.f32.mrf.mxu0 }
 0x1db   :  { %v784_v9 = vadd.f32 %v1215_v7, %v1183_v55  ;;  %v842_v12 = vadd.f32 %v1540_v3, %v773_v6  ;;  %v860_v16 = vmax.f32 %v844_v8, 0.0 }
 0x1dc   :  { %v775_v11 = vpop.f32.mrf.mxu0 }
 0x1dd   :  { %v845_v13 = vadd.f32 %v1540_v3, %v784_v9  ;;  %v776_v14 = vadd.f32 %v775_v11, %v630_v56  ;;  %v858_v22 = vmax.f32 %v842_v12, 0.0 }
 0x1de   :  { %v1218_v15 = vpop.f32.mrf.mxu0 }
 0x1df   :  { %v861_v17 = vmax.f32 %v845_v13, 0.0  ;;  %v843_v18 = vadd.f32 %v1540_v3, %v776_v14  ;;  %v797_v19 = vadd.f32 %v1218_v15, %v1186_v57 }
 0x1e0   :  { %v788_v21 = vpop.f32.mrf.mxu0 }
 0x1e1   :  { %v1045_v23 = vpack.c.bf16 %v861_v17, %v860_v16  ;;  %v859_v24 = vmax.f32 %v843_v18, 0.0  ;;  %v789_v25 = vadd.f32 %v788_v21, %v643_v58  ;;  %v848_v28 = vadd.f32 %v1540_v3, %v797_v19 }
 0x1e2   :  { %v1219_v26 = vpop.f32.mrf.mxu0 }
 0x1e3   :  { %1077 = vst [vmem:[#allocation9 + $0x8] sm:$0xff] %v1045_v23   ;;  %v1040_v27 = vpack.c.bf16 %v859_v24, %v858_v22  ;;  %v800_v29 = vadd.f32 %v1219_v26, %v1187_v59  ;;  %v846_v32 = vadd.f32 %v1540_v3, %v789_v25  ;;  %v864_v36 = vmax.f32 %v848_v28, 0.0 }
 0x1e4   :  { %v791_v31 = vpop.f32.mrf.mxu0 }
 0x1e5   :  { %1041 = vst [vmem:[#allocation9] sm:$0xff] %v1040_v27   ;;  %v849_v33 = vadd.f32 %v1540_v3, %v800_v29  ;;  %v792_v34 = vadd.f32 %v791_v31, %v646_v60  ;;  %v862_v41 = vmax.f32 %v846_v32, 0.0 }
 0x1e6   :  { %v1222_v35 = vpop.f32.mrf.mxu1 }
 0x1e7   :  { %v865_v37 = vmax.f32 %v849_v33, 0.0  ;;  %v847_v38 = vadd.f32 %v1540_v3, %v792_v34  ;;  %v813_v39 = vadd.f32 %v1222_v35, %v1190_v61 }
 0x1e8   :  { %v804_v40 = vpop.f32.mrf.mxu1 }
 0x1e9   :  { %v1055_v42 = vpack.c.bf16 %v865_v37, %v864_v36  ;;  %v863_v43 = vmax.f32 %v847_v38, 0.0  ;;  %v805_v44 = vadd.f32 %v804_v40, %v659_v62  ;;  %v852_v47 = vadd.f32 %v1540_v3, %v813_v39 }
 0x1ea   :  { %v1223_v45 = vpop.f32.mrf.mxu1 }
 0x1eb   :  { %1079 = vst [vmem:[#allocation9 + $0x18] sm:$0xff] %v1055_v42   ;;  %v1050_v46 = vpack.c.bf16 %v863_v43, %v862_v41  ;;  %v816_v48 = vadd.f32 %v1223_v45, %v1191_v63  ;;  %v850_v50 = vadd.f32 %v1540_v3, %v805_v44  ;;  %v868_v54 = vmax.f32 %v852_v47, 0.0 }
 0x1ec   :  { %v807_v49 = vpop.f32.mrf.mxu1 }
 0x1ed   :  { %1078 = vst [vmem:[#allocation9 + $0x10] sm:$0xff] %v1050_v46   ;;  %v853_v51 = vadd.f32 %v1540_v3, %v816_v48  ;;  %v808_v52 = vadd.f32 %v807_v49, %v662_v0  ;;  %v866_v59 = vmax.f32 %v850_v50, 0.0 }
 0x1ee   :  { %v1226_v53 = vpop.f32.mrf.mxu1 }
 0x1ef   :  { %v869_v55 = vmax.f32 %v853_v51, 0.0  ;;  %v851_v56 = vadd.f32 %v1540_v3, %v808_v52  ;;  %v829_v57 = vadd.f32 %v1226_v53, %v1194_v4 }
 0x1f0   :  { %v820_v58 = vpop.f32.mrf.mxu1 }
 0x1f1   :  { %v1065_v60 = vpack.c.bf16 %v869_v55, %v868_v54  ;;  %v867_v61 = vmax.f32 %v851_v56, 0.0  ;;  %v821_v62 = vadd.f32 %v820_v58, %v675_v10  ;;  %v856_v2 = vadd.f32 %v1540_v3, %v829_v57 }
 0x1f2   :  { %v1227_v1 = vpop.f32.mrf.mxu1 }
 0x1f3   :  { %1081 = vst [vmem:[#allocation9 + $0x28] sm:$0xff] %v1065_v60   ;;  %v1060_v63 = vpack.c.bf16 %v867_v61, %v866_v59  ;;  %v832_v5 = vadd.f32 %v1227_v1, %v1195_v20  ;;  %v854_v0 = vadd.f32 %v1540_v3, %v821_v62  ;;  %v872_v9 = vmax.f32 %v856_v2, 0.0 }
 0x1f4   :  { %v823_v6 = vpop.f32.mrf.mxu1 }
 0x1f5   :  { %1080 = vst [vmem:[#allocation9 + $0x20] sm:$0xff] %v1060_v63   ;;  %v857_v7 = vadd.f32 %v1540_v3, %v832_v5  ;;  %v824_v8 = vadd.f32 %v823_v6, %v678_v30  ;;  %v870_v10 = vmax.f32 %v854_v0, 0.0 }
 0x1f7   :  { %v873_v4 = vmax.f32 %v857_v7, 0.0  ;;  %v855_v11 = vadd.f32 %v1540_v3, %v824_v8 }
 0x1f9   :  { %v1075_v12 = vpack.c.bf16 %v873_v4, %v872_v9  ;;  %v871_v13 = vmax.f32 %v855_v11, 0.0 }
 0x1fb   :  { %1083 = vst [vmem:[#allocation9 + $0x38] sm:$0xff] %v1075_v12   ;;  %v1070_v14 = vpack.c.bf16 %v871_v13, %v870_v10 }
 0x1fd   :  { %1082 = vst [vmem:[#allocation9 + $0x30] sm:$0xff] %v1070_v14  }
 0x1fe   :  { %1358 = shalt.err (!%p1355_p5)
}
 0x1ff   :  { %965 = dma.vmem_to_hbm [thread:$0]  %s960_s10, 1024, %s1571_s7, [#allocation5], %s1374_s27, %s1374_s27, %s1375_s28  }
 0x200   :  { %1371 = dma.done.wait [#allocation5], 1024  }
 0x201   :  { %1372 = vsyncadd [#allocation5], 4294966272 }
 0x202   :  { %969 = vsyncpa [#allocation4], 1 }
 0x203   :  { %970 = vsyncpa [#allocation7], 1 }
 0x204   :  { %971 = vsyncpa [#allocation5], 1 }

</bundles_post_ra>
